<compile_context>
chip_gen: v6e
topology: v6e:2x2x1
jax: 0.10.0
libtpu: 0.0.40
codegen_flags: <defaults>
</compile_context>

<pallas_src>
import functools

import jax
import jax.numpy as jnp
from jax import lax
from jax.experimental import pallas as pl
from jax.experimental.pallas import tpu as pltpu

LANES = 128
SUBLANES = 8
SLAB = SUBLANES * LANES  # 1024 elements = one (8,128) f32 vreg

_ARBITRARY = getattr(pltpu, "ARBITRARY", "arbitrary")
_CORE_PARALLEL = getattr(pltpu, "CORE_PARALLEL", getattr(pltpu, "PARALLEL", "parallel"))


def _chip_config():
    """Generation-aware row-tile / VMEM-limit / core-split selection."""
    try:
        kind = jax.devices()[0].device_kind.lower()
    except Exception:   # no device info -> conservative defaults
        kind = ""
    if "v7" in kind:
        # 2 TensorCores, 64 MiB physical VMEM, ~3.2 TB/s HBM: big tiles + both cores.
        # Budget: 3 inputs x 2 buffers x 4 MiB = 24 MiB + ~8 MiB temporaries < 48 MiB.
        return dict(row_tile=8192, vmem_limit=48 << 20, num_slices=2,
                    slice_semantics=_CORE_PARALLEL)
    if "v6" in kind:
        # Single TC, 128 MiB physical VMEM: 4096 rows = 2 MiB/input/buffer.
        return dict(row_tile=4096, vmem_limit=64 << 20, num_slices=1,
                    slice_semantics=_ARBITRARY)
    # v5e / unknown: single TC; 2048 rows = 1 MiB/input/buffer (6 MiB double-buffered).
    return dict(row_tile=2048, vmem_limit=32 << 20, num_slices=1,
                slice_semantics=_ARBITRARY)


def _hinge_disc_kernel(real_ref, fake_ref, mask_ref, out_ref, *,
                       rows, steps, need_mask):
    """Accumulate the sum of both hinge terms over one (row_tile, 128) tile."""
    s = pl.program_id(0)          # slice (one per TensorCore on v7x)
    k = pl.program_id(1)          # reduction step within the slice

    @pl.when(k == 0)
    def _():
        out_ref[...] = jnp.zeros_like(out_ref)

    real = real_ref[...].astype(jnp.float32)
    fake = fake_ref[...].astype(jnp.float32)
    mask = mask_ref[...].astype(jnp.float32)

    # Fused hinge terms: pure VPU elementwise, no transcendentals.
    t = (jnp.minimum(real * mask - 1.0, 0.0)
         + jnp.minimum(-fake * mask - 1.0, 0.0)) * mask

    row_tile = t.shape[0]

    def accumulate(v):
        # (row_tile,128) -> (row_tile//8, 8, 128) -> (8,128): sublane-group sum,
        # pure vreg adds (no XLU), accumulated into the resident output block.
        out_ref[...] += jnp.sum(v.reshape(-1, SUBLANES, LANES), axis=0)[None]

    if not need_mask:
        accumulate(t)
    else:
        # `valid` = number of rows of this tile inside [0, rows).  Only the final
        # partial block and clamped duplicate blocks have valid < row_tile, so the
        # masking work is runtime-gated off the hot loop with pl.when.
        blk = s * steps + k                      # unclamped logical block index
        valid = rows - blk * row_tile

        @pl.when(valid >= row_tile)
        def _():                                 # interior tile: pure hinge path
            accumulate(t)

        @pl.when(valid < row_tile)
        def _():                                 # ragged tail / duplicate block
            row_in_tile = lax.broadcasted_iota(jnp.int32, t.shape, 0)
            accumulate(jnp.where(row_in_tile < valid, t, 0.0))


def _hinge_sum_flat(real, fake, mask):
    """Tiny pure-JAX hinge-term sum (used for the <1024-element ragged tail)."""
    r = real.astype(jnp.float32)
    f = fake.astype(jnp.float32)
    m = mask.astype(jnp.float32)
    return jnp.sum((jnp.minimum(r * m - 1.0, 0.0)
                    + jnp.minimum(-f * m - 1.0, 0.0)) * m)


def hinge_discriminator_loss(disc_real_output, disc_fake_output, cloudmask,
                             *, row_tile=None, num_slices=None):
    """Pallas implementation of HingeDiscriminator.forward.

    `row_tile` / `num_slices` are test-only overrides; the defaults (None) pick
    chip-appropriate values.
    """
    assert disc_real_output.shape == disc_fake_output.shape == cloudmask.shape
    n = disc_real_output.size
    cfg = _chip_config()

    prefix = (n // SLAB) * SLAB          # elements handled by the Pallas kernel
    rows = prefix // LANES               # always a multiple of 8

    # Keep HBM traffic narrow: no wrapper-side f32 upcast (done in VMEM), and bool
    # masks ship as 1 byte.  int8 sublane tiles prefer row counts that are
    # multiples of 32; fall back to f32 otherwise (rare, and only for bool masks).
    bool_dtype = jnp.int8 if rows % 32 == 0 else jnp.float32

    def prep(x):
        if x.dtype == jnp.bool_:
            x = x.astype(bool_dtype)
        return jnp.ravel(x)

    r = prep(disc_real_output)
    f = prep(disc_fake_output)
    m = prep(cloudmask)

    total = jnp.float32(0.0)

    if prefix > 0:
        rt = row_tile if row_tile is not None else cfg["row_tile"]
        rt = min(rt, rows)
        assert rt % SUBLANES == 0
        n_blocks = pl.cdiv(rows, rt)
        ns = num_slices if num_slices is not None else cfg["num_slices"]
        ns = ns if n_blocks > 1 else 1
        steps = pl.cdiv(n_blocks, ns)
        need_mask = (ns * steps * rt != rows)

        def in_index(s, k):
            blk = s * steps + k
            if ns * steps != n_blocks:
                # Odd block count across slices: clamp in-bounds; the duplicate
                # block is fully zeroed in-kernel (its `valid` is <= 0).
                blk = jnp.minimum(blk, n_blocks - 1)
            return (blk, 0)

        in_spec = pl.BlockSpec((rt, LANES), in_index)
        kernel = functools.partial(_hinge_disc_kernel, rows=rows, steps=steps,
                                   need_mask=need_mask)

        slice_sem = cfg["slice_semantics"] if ns > 1 else _ARBITRARY
        # TODO(synk): optionally sweep pipeline_mode=pl.Buffered(3) on v7x if xprof
        # shows exposed DMA at step boundaries.

        partials = pl.pallas_call(
            kernel,
            out_shape=jax.ShapeDtypeStruct((ns, SUBLANES, LANES), jnp.float32),
            grid_spec=pltpu.PrefetchScalarGridSpec(
                num_scalar_prefetch=0,
                grid=(ns, steps),
                in_specs=[in_spec, in_spec, in_spec],
                out_specs=pl.BlockSpec((1, SUBLANES, LANES), lambda s, k: (s, 0, 0)),
            ),
            compiler_params=pltpu.CompilerParams(
                dimension_semantics=(slice_sem, _ARBITRARY),
                vmem_limit_bytes=cfg["vmem_limit"],
            ),
        )(r[:prefix].reshape(rows, LANES),
          f[:prefix].reshape(rows, LANES),
          m[:prefix].reshape(rows, LANES))

        total = total + jnp.sum(partials)

    if prefix < n:
        # Ragged tail (< 1024 elements): fold into the tiny JAX epilogue instead of
        # padding every input (avoids a full extra HBM read+write pass).
        total = total + _hinge_sum_flat(r[prefix:], f[prefix:], m[prefix:])

    # Mean is over the original element count (matches torch.mean semantics).
    return -(total / jnp.float32(n))


def _reference(real, fake, mask):
    r = jnp.asarray(real, jnp.float32)
    f = jnp.asarray(fake, jnp.float32)
    m = jnp.asarray(mask, jnp.float32)
    loss = -jnp.mean(jnp.minimum(r * m - 1.0, 0.0) * m)
    loss -= jnp.mean(jnp.minimum(-f * m - 1.0, 0.0) * m)
    return loss


if __name__ == "__main__":
    key = jax.random.PRNGKey(0)

    # Case 1: primary small aligned NCHW case.
    # Case 2: ragged element count -> Pallas prefix + tiny JAX tail.
    # Case 3: bool cloudmask -> 1-byte int8 slab path.
    # Case 4: small-tile/2-slice override -> multi-block reduction, the pl.when-gated
    #         ragged-row mask, and the clamped duplicate-block path of the core split.
    cases = [
        dict(shape=(2, 4, 16, 16), bool_mask=False, row_tile=None, num_slices=None),
        dict(shape=(2, 4, 130, 130), bool_mask=False, row_tile=None, num_slices=None),
        dict(shape=(2, 5, 160, 164), bool_mask=True, row_tile=None, num_slices=None),
        dict(shape=(2, 4, 130, 130), bool_mask=False, row_tile=256, num_slices=2),
    ]
    for c in cases:
        k1, k2, k3, key = jax.random.split(key, 4)
        disc_real = jax.random.normal(k1, c["shape"], dtype=jnp.float32)
        disc_fake = jax.random.normal(k2, c["shape"], dtype=jnp.float32)
        cloudmask = jax.random.uniform(k3, c["shape"]) > 0.5
        if not c["bool_mask"]:
            cloudmask = cloudmask.astype(jnp.float32)

        loss = hinge_discriminator_loss(disc_real, disc_fake, cloudmask,
                                        row_tile=c["row_tile"],
                                        num_slices=c["num_slices"])
        loss = jax.block_until_ready(loss)

        ref = _reference(disc_real, disc_fake, cloudmask)
        assert jnp.allclose(loss, ref, rtol=1e-5, atol=1e-5), (c, loss, ref)

    print("KERNEL_OK")
</pallas_src>

<mosaic_0001>
module attributes {stable_mosaic.version = 11 : i64} {
  func.func @_hinge_disc_kernel(%arg0: i32, %arg1: i32, %arg2: memref<16x128xf32, #tpu.memory_space<vmem>>, %arg3: memref<16x128xf32, #tpu.memory_space<vmem>>, %arg4: memref<16x128xf32, #tpu.memory_space<vmem>>, %arg5: memref<1x8x128xf32, #tpu.memory_space<vmem>>) attributes {dimension_semantics = [#tpu.dimension_semantics<arbitrary>, #tpu.dimension_semantics<arbitrary>], iteration_bounds = array<i64: 1, 1>, scalar_prefetch = 0 : i64, scratch_operands = 0 : i64, tpu.core_type = #tpu.core_type<tc>, window_params = [{transform_indices = @transform_0, window_bounds = array<i64: 16, 128>}, {transform_indices = @transform_1, window_bounds = array<i64: 16, 128>}, {transform_indices = @transform_2, window_bounds = array<i64: 16, 128>}, {transform_indices = @transform_3, window_bounds = array<i64: 1, 8, 128>}]} {
    %c0_i32 = arith.constant 0 : i32
    %0 = arith.cmpi eq, %arg1, %c0_i32 : i32
    %1 = arith.extui %0 : i1 to i32
    %c0_i32_0 = arith.constant 0 : i32
    %2 = arith.cmpi ne, %1, %c0_i32_0 : i32
    scf.if %2 {
      %cst_17 = arith.constant 0.000000e+00 : f32
      %26 = vector.broadcast %cst_17 : f32 to vector<1x8x128xf32>
      %c0_18 = arith.constant 0 : index
      %c0_19 = arith.constant 0 : index
      %c0_20 = arith.constant 0 : index
      %27 = vector.load %arg5[%c0_18, %c0_19, %c0_20] : memref<1x8x128xf32, #tpu.memory_space<vmem>>, vector<1x8x128xf32>
      tpu.vector_store %arg5[%c0_18, %c0_19, %c0_20], %26 {strides = array<i32>} : memref<1x8x128xf32, #tpu.memory_space<vmem>>, vector<1x8x128xf32>,
    } else {
    }
    %c0 = arith.constant 0 : index
    %c0_1 = arith.constant 0 : index
    %3 = vector.load %arg2[%c0, %c0_1] : memref<16x128xf32, #tpu.memory_space<vmem>>, vector<16x128xf32>
    %c0_2 = arith.constant 0 : index
    %c0_3 = arith.constant 0 : index
    %4 = vector.load %arg3[%c0_2, %c0_3] : memref<16x128xf32, #tpu.memory_space<vmem>>, vector<16x128xf32>
    %c0_4 = arith.constant 0 : index
    %c0_5 = arith.constant 0 : index
    %5 = vector.load %arg4[%c0_4, %c0_5] : memref<16x128xf32, #tpu.memory_space<vmem>>, vector<16x128xf32>
    %6 = arith.mulf %3, %5 : vector<16x128xf32>
    %cst = arith.constant 1.000000e+00 : f32
    %7 = vector.broadcast %cst : f32 to vector<16x128xf32>
    %8 = arith.subf %6, %7 : vector<16x128xf32>
    %cst_6 = arith.constant 0.000000e+00 : f32
    %9 = vector.broadcast %cst_6 : f32 to vector<16x128xf32>
    %10 = arith.minimumf %8, %9 : vector<16x128xf32>
    %cst_7 = arith.constant 0.000000e+00 : f32
    %11 = vector.broadcast %cst_7 : f32 to vector<16x128xf32>
    %12 = arith.subf %11, %4 : vector<16x128xf32>
    %13 = arith.mulf %12, %5 : vector<16x128xf32>
    %cst_8 = arith.constant 1.000000e+00 : f32
    %14 = vector.broadcast %cst_8 : f32 to vector<16x128xf32>
    %15 = arith.subf %13, %14 : vector<16x128xf32>
    %cst_9 = arith.constant 0.000000e+00 : f32
    %16 = vector.broadcast %cst_9 : f32 to vector<16x128xf32>
    %17 = arith.minimumf %15, %16 : vector<16x128xf32>
    %18 = arith.addf %10, %17 : vector<16x128xf32>
    %19 = arith.mulf %18, %5 : vector<16x128xf32>
    %c0_10 = arith.constant 0 : index
    %c0_11 = arith.constant 0 : index
    %c0_12 = arith.constant 0 : index
    %20 = vector.load %arg5[%c0_10, %c0_11, %c0_12] : memref<1x8x128xf32, #tpu.memory_space<vmem>>, vector<1x8x128xf32>
    %21 = vector.shape_cast %19 : vector<16x128xf32> to vector<2x8x128xf32>
    %cst_13 = arith.constant dense<0.000000e+00> : vector<8x128xf32>
    %22 = vector.multi_reduction <add>, %21, %cst_13 [0] : vector<2x8x128xf32> to vector<8x128xf32>
    %23 = vector.shape_cast %22 : vector<8x128xf32> to vector<1x8x128xf32>
    %24 = arith.addf %20, %23 : vector<1x8x128xf32>
    %c0_14 = arith.constant 0 : index
    %c0_15 = arith.constant 0 : index
    %c0_16 = arith.constant 0 : index
    %25 = vector.load %arg5[%c0_14, %c0_15, %c0_16] : memref<1x8x128xf32, #tpu.memory_space<vmem>>, vector<1x8x128xf32>
    tpu.vector_store %arg5[%c0_14, %c0_15, %c0_16], %24 {strides = array<i32>} : memref<1x8x128xf32, #tpu.memory_space<vmem>>, vector<1x8x128xf32>,
    return
  }
  func.func @transform_0(%arg0: i32, %arg1: i32) -> (i32, i32) {
    %c1_i32 = arith.constant 1 : i32
    %0 = arith.muli %arg0, %c1_i32 : i32
    %1 = arith.addi %0, %arg1 : i32
    %c0_i32 = arith.constant 0 : i32
    %c0_i32_0 = arith.constant 0 : i32
    return %1, %c0_i32 : i32, i32
  }
  func.func @transform_1(%arg0: i32, %arg1: i32) -> (i32, i32) {
    %c1_i32 = arith.constant 1 : i32
    %0 = arith.muli %arg0, %c1_i32 : i32
    %1 = arith.addi %0, %arg1 : i32
    %c0_i32 = arith.constant 0 : i32
    %c0_i32_0 = arith.constant 0 : i32
    return %1, %c0_i32 : i32, i32
  }
  func.func @transform_2(%arg0: i32, %arg1: i32) -> (i32, i32) {
    %c1_i32 = arith.constant 1 : i32
    %0 = arith.muli %arg0, %c1_i32 : i32
    %1 = arith.addi %0, %arg1 : i32
    %c0_i32 = arith.constant 0 : i32
    %c0_i32_0 = arith.constant 0 : i32
    return %1, %c0_i32 : i32, i32
  }
  func.func @transform_3(%arg0: i32, %arg1: i32) -> (i32, i32, i32) {
    %c0_i32 = arith.constant 0 : i32
    %c0_i32_0 = arith.constant 0 : i32
    %c0_i32_1 = arith.constant 0 : i32
    return %arg0, %c0_i32, %c0_i32_0 : i32, i32, i32
  }
}

</mosaic_0001>

<bundles_post_ra>
// kernel: tpu_custom_call.1
= control target key start
LH: loop header
LB: loop body
LE: loop exit
PB: predicated region body
PF: predicated region fallthrough
CT: control target
= control target key end

     0   :  { %8 = vsyncpa [#allocation3], 0  ;;  %s258_s0 = inlined_call_operand.hbm [shape: f32[16,128], index: 0, kind: input, shape index: {}]   ;;  %s259_s1 = inlined_call_operand.hbm [shape: f32[16,128], index: 1, kind: input, shape index: {}]   ;;  %s260_s2 = inlined_call_operand.hbm [shape: f32[16,128], index: 2, kind: input, shape index: {}]   ;;  %s261_s3 = inlined_call_operand.hbm [shape: f32[1,8,128], index: 3, kind: output, shape index: {}]  }
   0x1   :  { %9 = vsyncpa [#allocation6], 0 }
   0x2   :  { %10 = vsyncpa [#allocation4], 0  ;;  %s220_s12 = smov [#allocation5]   ;;  %s221_s14 = smov [#allocation2]  }
   0x3   :  { %s36_s13 = sshll.u32 %s220_s12, 4  ;;  %s20_s15 = sshll.u32 %s221_s14, 4  ;;  %s37_s13 = int_to_ptr.vmem [resolvable:$true] %s36_s13  ;;  %s21_s15 = int_to_ptr.vmem [resolvable:$true] %s20_s15 }
   0x4   :  { %s142_s16 = scalar_lea.vmem %s37_s13, 256  ;;  %p147_p1 = scmp.lt.s32.totalorder %s37_s13, %s37_s13 }
   0x5   :  { %p143_p0 = scmp.ne.s32.totalorder %s37_s13, %s142_s16  ;;  %p148_p2 = scmp.lt.s32.totalorder %s142_s16, %s142_s16 }
   0x7   :  { %p149_p3 = por %p148_p2, %p147_p1 }
   0x9   :  { %p150_p4 = pnand %p149_p3, %p143_p0 }
   0xb   :  { %153 = shalt.err (!%p150_p4)
}
   0xc   :  { %s222_s17 = smov 128   ;;  %s223_s18 = smov 8  }
   0xd   :  { %42 = dma.hbm_to_vmem [thread:$0]  %s259_s1, 256, %s37_s13, [#allocation6], %s222_s17, %s222_s17, %s223_s18  }
   0xe   :  { %s162_s21 = scalar_lea.vmem %s21_s15, 256  ;;  %p167_p6 = scmp.lt.s32.totalorder %s21_s15, %s21_s15 }
   0xf   :  { %p163_p5 = scmp.ne.s32.totalorder %s21_s15, %s162_s21  ;;  %p168_p7 = scmp.lt.s32.totalorder %s162_s21, %s162_s21 }
  0x11   :  { %p169_p8 = por %p168_p7, %p167_p6 }
  0x13   :  { %p170_p9 = pnand %p169_p8, %p163_p5 }
  0x15   :  { %173 = shalt.err (!%p170_p9)
}
  0x16   :  { %26 = dma.hbm_to_vmem [thread:$0]  %s258_s0, 256, %s21_s15, [#allocation3], %s222_s17, %s222_s17, %s223_s18  }
  0x17   :  { %s224_s24 = smov [#allocation7]  }
  0x18   :  { %s52_s25 = sshll.u32 %s224_s24, 4  ;;  %s53_s25 = int_to_ptr.vmem [resolvable:$true] %s52_s25 }
  0x19   :  { %s182_s26 = scalar_lea.vmem %s53_s25, 256  ;;  %p187_p11 = scmp.lt.s32.totalorder %s53_s25, %s53_s25 }
  0x1a   :  { %p183_p10 = scmp.ne.s32.totalorder %s53_s25, %s182_s26  ;;  %p188_p12 = scmp.lt.s32.totalorder %s182_s26, %s182_s26 }
  0x1c   :  { %p189_p13 = por %p188_p12, %p187_p11 }
  0x1e   :  { %p190_p0 = pnand %p189_p13, %p183_p10 }
  0x20   :  { %193 = shalt.err (!%p190_p0)
}
  0x21   :  { %58 = dma.hbm_to_vmem [thread:$0]  %s260_s2, 256, %s53_s25, [#allocation6], %s222_s17, %s222_s17, %s223_s18  }
  0x22   :  { %214 = dma.done.wait [#allocation3], 256  }
  0x23   :  { %215 = vsyncadd [#allocation3], 4294967040 }
  0x24   :  { %216 = dma.done.wait [#allocation6], 512  }
  0x25   :  { %217 = vsyncadd [#allocation6], 4294966784  ;;  %v79_v0 = vld [vmem:[#allocation2] sm:$0xff]  ;;  %v80_v1 = vld [vmem:[#allocation2 + $0x8] sm:$0xff]  ;;  %s225_s0 = smov [#allocation8]  }
  0x26   :  { %v81_v2 = vld [vmem:[#allocation5] sm:$0xff]  ;;  %v82_v3 = vld [vmem:[#allocation5 + $0x8] sm:$0xff]  ;;  %v83_v4 = vld [vmem:[#allocation7] sm:$0xff]  ;;  %s113_s2 = sshll.u32 %s225_s0, 4  ;;  %s114_s2 = int_to_ptr.vmem [resolvable:$true] %s113_s2 }
  0x27   :  { %v84_v5 = vld [vmem:[#allocation7 + $0x8] sm:$0xff]  ;;  %v91_v6 = vsub.f32 0.0, %v81_v2  ;;  %v85_v7 = vmul.f32 %v83_v4, %v79_v0  ;;  %v92_v9 = vsub.f32 0.0, %v82_v3  ;;  %s194_s28 = scalar_lea.vmem %s114_s2, 128  ;;  %p199_p2 = scmp.lt.s32.totalorder %s114_s2, %s114_s2 }
  0x28   :  { %v86_v8 = vmul.f32 %v84_v5, %v80_v1  ;;  %p195_p1 = scmp.ne.s32.totalorder %s114_s2, %s194_s28  ;;  %p200_p3 = scmp.lt.s32.totalorder %s194_s28, %s194_s28 }
  0x29   :  { %v93_v10 = vmul.f32 %v91_v6, %v83_v4  ;;  %v123_v11 = vadd.f32 -1.0, %v85_v7  ;;  %v94_v13 = vmul.f32 %v92_v9, %v84_v5 }
  0x2a   :  { %v124_v12 = vadd.f32 -1.0, %v86_v8  ;;  %p201_p4 = por %p200_p3, %p199_p2 }
  0x2b   :  { %v125_v14 = vadd.f32 -1.0, %v93_v10  ;;  %v89_v15 = vmin.f32 %v123_v11, 0.0  ;;  %v126_v17 = vadd.f32 -1.0, %v94_v13 }
  0x2c   :  { %v90_v16 = vmin.f32 %v124_v12, 0.0  ;;  %p202_p5 = pnand %p201_p4, %p195_p1 }
  0x2d   :  { %v97_v18 = vmin.f32 %v125_v14, 0.0  ;;  %v98_v19 = vmin.f32 %v126_v17, 0.0 }
  0x2f   :  { %v99_v20 = vadd.f32 %v97_v18, %v89_v15  ;;  %v100_v21 = vadd.f32 %v98_v19, %v90_v16 }
  0x31   :  { %v101_v22 = vmul.f32 %v99_v20, %v83_v4  ;;  %v102_v23 = vmul.f32 %v100_v21, %v84_v5 }
  0x33   :  { %v104_v24 = vadd.f32 %v102_v23, %v101_v22 }
  0x35   :  { %106 = vst [vmem:[#allocation8] sm:$0xff] %v104_v24 }
  0x36   :  { %205 = shalt.err (!%p202_p5)
}
  0x37   :  { %116 = dma.vmem_to_hbm [thread:$0]  %s114_s2, 128, %s261_s3, [#allocation4]  }
  0x38   :  { %218 = dma.done.wait [#allocation4], 128  }
  0x39   :  { %219 = vsyncadd [#allocation4], 4294967168 }
  0x3a   :  { %120 = vsyncpa [#allocation3], 1 }
  0x3b   :  { %121 = vsyncpa [#allocation6], 1 }
  0x3c   :  { %122 = vsyncpa [#allocation4], 1 }

</bundles_post_ra>
